<compile_context>
chip_gen: v7x
topology: tpu7x:2x2x1
jax: 0.10.0
libtpu: 0.0.40
codegen_flags: <defaults>
</compile_context>

<pallas_src>
import math
import functools

import jax
import jax.numpy as jnp
from jax.experimental import pallas as pl
from jax.experimental.pallas import tpu as pltpu


# --------------------------------------------------------------------------
# config / tiling helpers
# --------------------------------------------------------------------------

def _tile(dim, pref, align):
    """Largest tile <= pref that is a multiple of `align` and divides `dim`
    exactly (falls back to the full dim).  Keeps BlockSpec (8,128) rules happy."""
    if dim <= pref:
        return dim
    t = pref - (pref % align)
    while t >= align:
        if dim % t == 0:
            return t
        t -= align
    return dim


def make_config(compute_dtype=jnp.bfloat16):
    kind = ""
    try:
        kind = jax.devices()[0].device_kind.lower()
    except Exception:
        pass
    if "v7" in kind:
        # v7x: 64 MiB physical VMEM -> modest tiles, keep scoped limit at 32 MiB.
        tm, tn, tk, vmem = 256, 512, 512, 32 * 1024 * 1024
    elif "v6" in kind or "v5" in kind:
        # v5e/v5p/v6e: 128 MiB VMEM -> larger tiles, raise scoped limit above default.
        tm, tn, tk, vmem = 512, 512, 1024, 64 * 1024 * 1024
    else:
        # Unknown generation: conservative tiles, leave scoped VMEM limit alone.
        tm, tn, tk, vmem = 256, 256, 512, None
    # TODO(synk): pad M to a multiple of the row tile for ragged B*seq at production sizes.
    return dict(tm=tm, tn=tn, tk=tk, vmem=vmem, compute_dtype=compute_dtype)


def _cparams(dims, cfg):
    kw = dict(dimension_semantics=dims)
    if cfg["vmem"] is not None:
        kw["vmem_limit_bytes"] = cfg["vmem"]
    return pltpu.CompilerParams(**kw)


# --------------------------------------------------------------------------
# in-kernel math helpers
# --------------------------------------------------------------------------

_INV_SQRT2 = 1.0 / math.sqrt(2.0)


def _erf_approx(x):
    # Abramowitz & Stegun 7.1.26 rational approximation, |err| < 1.5e-7.
    # TODO(synk): switch to jax.lax.erf in-kernel once its Mosaic lowering is guaranteed.
    a1, a2, a3, a4, a5 = 0.254829592, -0.284496736, 1.421413741, -1.453152027, 1.061405429
    z = jnp.abs(x)
    t = 1.0 / (1.0 + 0.3275911 * z)
    poly = ((((a5 * t + a4) * t + a3) * t + a2) * t + a1) * t
    e = 1.0 - poly * jnp.exp(-z * z)
    return jnp.where(x >= 0, e, -e)


# --------------------------------------------------------------------------
# Pallas kernels
# --------------------------------------------------------------------------

def _ln_matmul_kernel(x_ref, g_ref, b_ref, w_ref, bias_ref, o_ref, *,
                      eps, activation, compute_dtype):
    """LayerNorm prologue + matmul (full-K block) + optional exact erf-GELU epilogue."""
    x = x_ref[...].astype(jnp.float32)                          # (tm, K)
    mean = jnp.mean(x, axis=-1, keepdims=True)
    cen = x - mean
    var = jnp.mean(cen * cen, axis=-1, keepdims=True)
    xn = cen * jax.lax.rsqrt(var + eps)
    xn = xn * g_ref[...].astype(jnp.float32) + b_ref[...].astype(jnp.float32)
    y = jnp.dot(xn.astype(compute_dtype), w_ref[...].astype(compute_dtype),
                preferred_element_type=jnp.float32)
    y = y + bias_ref[...].astype(jnp.float32)
    if activation == "gelu":
        y = y * 0.5 * (1.0 + _erf_approx(y * _INV_SQRT2))
    o_ref[...] = y.astype(o_ref.dtype)


def _matmul_res_kernel(x_ref, w_ref, bias_ref, res_ref, o_ref, acc_ref, *,
                       compute_dtype):
    """Tiled (M, N, K) matmul with f32 accumulator; bias + residual fused in epilogue."""
    k = pl.program_id(2)

    @pl.when(k == 0)
    def _init():
        acc_ref[...] = jnp.zeros_like(acc_ref)

    acc_ref[...] += jnp.dot(x_ref[...].astype(compute_dtype),
                            w_ref[...].astype(compute_dtype),
                            preferred_element_type=jnp.float32)

    @pl.when(k == pl.num_programs(2) - 1)
    def _finalize():
        y = acc_ref[...] + bias_ref[...].astype(jnp.float32) \
            + res_ref[...].astype(jnp.float32)
        o_ref[...] = y.astype(o_ref.dtype)


def _attention_kernel(q_ref, k_ref, v_ref, qc_ref, kc_ref, vc_ref,
                      o_ref, oc_ref, *, scale, compute_dtype):
    """Per (batch*head) grid step.

    q/k/v: (A, T, dh)  -- A independent groups, each attending over its T keys + CLS key.
    qc/kc/vc: (1, dh)  -- the CLS query/key/value of this (batch, head).
    Outputs: patch attention (A, T, dh) and CLS attention (1, dh).
    The CLS key/value column is added inside the kernel (no HBM broadcast/concat).
    """
    f32 = jnp.float32
    q_f = q_ref[...].astype(f32)
    k_f = k_ref[...].astype(f32)
    v_f = v_ref[...].astype(f32)
    qc = qc_ref[...].astype(f32)
    kc = kc_ref[...].astype(f32)
    vc = vc_ref[...].astype(f32)

    q = q_f.astype(compute_dtype)
    k = k_f.astype(compute_dtype)
    v = v_f.astype(compute_dtype)

    # ---- patch queries: attend over the T keys of their own group + the CLS key ----
    s_p = jnp.einsum("atd,asd->ats", q, k,
                     preferred_element_type=f32) * scale                 # (A, T, T)
    s_c = jnp.sum(q_f * kc[None, :, :], axis=-1, keepdims=True) * scale  # (A, T, 1)
    m = jnp.maximum(jnp.max(s_p, axis=-1, keepdims=True), s_c)           # (A, T, 1)
    e_p = jnp.exp(s_p - m)                                               # (A, T, T)
    e_c = jnp.exp(s_c - m)                                               # (A, T, 1)
    denom = jnp.sum(e_p, axis=-1, keepdims=True) + e_c                   # (A, T, 1)
    pv = jnp.einsum("ats,asd->atd", e_p.astype(compute_dtype), v,
                    preferred_element_type=f32)                          # (A, T, dh)
    out = (pv + e_c * vc[None, :, :]) * pl.reciprocal(denom, approx=True)
    o_ref[...] = out.astype(o_ref.dtype)

    # ---- CLS query: attends over all A*T patch keys + the CLS key (order-invariant) ----
    s_cp = jnp.sum(k_f * qc[None, :, :], axis=-1, keepdims=True) * scale  # (A, T, 1)
    s_cc = (jnp.sum(kc * qc, axis=-1, keepdims=True) * scale)[None]       # (1, 1, 1)
    m_c = jnp.maximum(
        jnp.max(jnp.max(s_cp, axis=1, keepdims=True), axis=0, keepdims=True), s_cc)
    e_cp = jnp.exp(s_cp - m_c)                                            # (A, T, 1)
    e_cc = jnp.exp(s_cc - m_c)                                            # (1, 1, 1)
    den_c = jnp.sum(jnp.sum(e_cp, axis=0, keepdims=True),
                    axis=1, keepdims=True) + e_cc                         # (1, 1, 1)
    num_c = jnp.sum(jnp.sum(e_cp * v_f, axis=0, keepdims=True),
                    axis=1, keepdims=True) + e_cc * vc[None]              # (1, 1, dh)
    oc = (num_c * pl.reciprocal(den_c, approx=True))[0]                   # (1, dh)
    oc_ref[...] = oc.astype(oc_ref.dtype)


# --------------------------------------------------------------------------
# Pallas wrappers
# --------------------------------------------------------------------------

def pallas_ln_linear(x2, gamma, beta, w, bias, *, activation, cfg, eps=1e-12):
    M, K = x2.shape
    N = w.shape[1]
    tm = _tile(M, cfg["tm"], 8)
    tn = _tile(N, cfg["tn"], 128)
    grid = (M // tm, N // tn)
    kernel = functools.partial(_ln_matmul_kernel, eps=eps, activation=activation,
                               compute_dtype=cfg["compute_dtype"])
    return pl.pallas_call(
        kernel,
        grid=grid,
        in_specs=[pl.BlockSpec((tm, K), lambda i, j: (i, 0)),
                  pl.BlockSpec((1, K), lambda i, j: (0, 0)),
                  pl.BlockSpec((1, K), lambda i, j: (0, 0)),
                  pl.BlockSpec((K, tn), lambda i, j: (0, j)),
                  pl.BlockSpec((1, tn), lambda i, j: (0, j))],
        out_specs=pl.BlockSpec((tm, tn), lambda i, j: (i, j)),
        out_shape=jax.ShapeDtypeStruct((M, N), x2.dtype),
        compiler_params=_cparams(("parallel", "parallel"), cfg),
    )(x2, gamma.reshape(1, K), beta.reshape(1, K), w, bias.reshape(1, N))


def pallas_linear_residual(x2, w, bias, res2, *, cfg):
    M, K = x2.shape
    N = w.shape[1]
    tm = _tile(M, cfg["tm"], 8)
    tn = _tile(N, cfg["tn"], 128)
    tk = _tile(K, cfg["tk"], 128)
    grid = (M // tm, N // tn, K // tk)
    kernel = functools.partial(_matmul_res_kernel, compute_dtype=cfg["compute_dtype"])
    return pl.pallas_call(
        kernel,
        grid=grid,
        in_specs=[pl.BlockSpec((tm, tk), lambda i, j, k: (i, k)),
                  pl.BlockSpec((tk, tn), lambda i, j, k: (k, j)),
                  pl.BlockSpec((1, tn), lambda i, j, k: (0, j)),
                  pl.BlockSpec((tm, tn), lambda i, j, k: (i, j))],
        out_specs=pl.BlockSpec((tm, tn), lambda i, j, k: (i, j)),
        out_shape=jax.ShapeDtypeStruct((M, N), x2.dtype),
        scratch_shapes=[pltpu.VMEM((tm, tn), jnp.float32)],
        compiler_params=_cparams(("parallel", "parallel", "arbitrary"), cfg),
    )(x2, w, bias.reshape(1, N), res2)


def pallas_attention(qp, kp, vp, qc, kc, vc, *, scale, cfg):
    G, A, T, dh = qp.shape
    kernel = functools.partial(_attention_kernel, scale=scale,
                               compute_dtype=cfg["compute_dtype"])
    patch_spec = pl.BlockSpec((None, A, T, dh), lambda g: (g, 0, 0, 0))
    cls_spec = pl.BlockSpec((None, 1, dh), lambda g: (g, 0, 0))
    return pl.pallas_call(
        kernel,
        grid=(G,),
        in_specs=[patch_spec, patch_spec, patch_spec, cls_spec, cls_spec, cls_spec],
        out_specs=(patch_spec, cls_spec),
        out_shape=(jax.ShapeDtypeStruct((G, A, T, dh), qp.dtype),
                   jax.ShapeDtypeStruct((G, 1, dh), qp.dtype)),
        compiler_params=_cparams(("parallel",), cfg),
    )(qp, kp, vp, qc, kc, vc)


# --------------------------------------------------------------------------
# Pallas forward (mirrors the PyTorch module semantics)
# --------------------------------------------------------------------------

def pallas_mha_block(p, ln_g, ln_b, hidden, mode, head_num, frame_num, cfg):
    """LayerNorm -> MultiHeadAttention(mode) -> output projection, residual add fused."""
    B, L, H = hidden.shape
    dh = H // head_num
    x2 = hidden.reshape(B * L, H)

    # fused LN + QKV projection: a single (H, 3H) GEMM, then split per head
    qkv = pallas_ln_linear(x2, ln_g, ln_b, p["w_qkv"], p["b_qkv"],
                           activation="none", cfg=cfg)
    qkv = qkv.reshape(B, L, 3, head_num, dh)
    q, k, v = qkv[:, :, 0], qkv[:, :, 1], qkv[:, :, 2]       # (B, L, heads, dh)

    qc = q[:, 0].reshape(B * head_num, 1, dh)                # CLS token q/k/v per (b, h)
    kc = k[:, 0].reshape(B * head_num, 1, dh)
    vc = v[:, 0].reshape(B * head_num, 1, dh)

    patch_num = (L - 1) // frame_num

    def arrange(t):
        t = t[:, 1:].reshape(B, frame_num, patch_num, head_num, dh)
        if mode == "time":
            t = jnp.transpose(t, (0, 3, 2, 1, 4))            # (B, heads, P, F, dh)
        elif mode == "space":
            t = jnp.transpose(t, (0, 3, 1, 2, 4))            # (B, heads, F, P, dh)
        else:
            raise NotImplementedError(mode)
        return t.reshape(B * head_num, t.shape[2], t.shape[3], dh)

    qp, kp, vp = arrange(q), arrange(k), arrange(v)
    patch_out, cls_out = pallas_attention(qp, kp, vp, qc, kc, vc,
                                          scale=1.0 / math.sqrt(dh), cfg=cfg)

    A, T = patch_out.shape[1], patch_out.shape[2]
    po = patch_out.reshape(B, head_num, A, T, dh)
    if mode == "time":
        po = jnp.transpose(po, (0, 3, 2, 1, 4))              # (B, F, P, heads, dh)
    else:
        po = jnp.transpose(po, (0, 2, 3, 1, 4))              # (B, F, P, heads, dh)
    po = po.reshape(B, L - 1, H)
    co = cls_out.reshape(B, 1, H)
    attn = jnp.concatenate((co, po), axis=1)                 # (B, L, H) raw attention

    # deferred output projection over the whole sequence + fused residual add
    out = pallas_linear_residual(attn.reshape(B * L, H), p["wo"], p["bo"], x2, cfg=cfg)
    return out.reshape(B, L, H)


def timesformer_layer_pallas(p, hidden_states, head_num, frame_num, cfg):
    # video_encoder_type == 'timesformer_time_space'; dropout is identity (eval mode).
    B, L, H = hidden_states.shape
    hidden_states = pallas_mha_block(p["attn_time"], p["ln1_g"], p["ln1_b"],
                                     hidden_states, "time", head_num, frame_num, cfg)
    hidden_states = pallas_mha_block(p["attn_space"], p["ln2_g"], p["ln2_b"],
                                     hidden_states, "space", head_num, frame_num, cfg)
    x2 = hidden_states.reshape(B * L, H)
    h1 = pallas_ln_linear(x2, p["ln3_g"], p["ln3_b"], p["ff"]["w1"], p["ff"]["b1"],
                          activation="gelu", cfg=cfg)
    out = pallas_linear_residual(h1, p["ff"]["w2"], p["ff"]["b2"], x2, cfg=cfg)
    return out.reshape(B, L, H)


def prepare_pallas_params(params, compute_dtype):
    """Fuse Q/K/V weights into one (H, 3H) matrix and pre-cast matmul weights to bf16 once."""
    cd = compute_dtype

    def mha(p):
        return {"w_qkv": jnp.concatenate([p["wq"], p["wk"], p["wv"]], axis=1).astype(cd),
                "b_qkv": jnp.concatenate([p["bq"], p["bk"], p["bv"]]),
                "wo": p["wo"].astype(cd), "bo": p["bo"]}

    return {
        "attn_time": mha(params["attn_time"]),
        "attn_space": mha(params["attn_space"]),
        "ln1_g": params["ln1_g"], "ln1_b": params["ln1_b"],
        "ln2_g": params["ln2_g"], "ln2_b": params["ln2_b"],
        "ln3_g": params["ln3_g"], "ln3_b": params["ln3_b"],
        "ff": {"w1": params["ff"]["w1"].astype(cd), "b1": params["ff"]["b1"],
               "w2": params["ff"]["w2"].astype(cd), "b2": params["ff"]["b2"]},
    }


# --------------------------------------------------------------------------
# pure-JAX reference (mirrors the PyTorch module exactly, f32 throughout)
# --------------------------------------------------------------------------

def _ref_layernorm(x, g, b, eps=1e-12):
    mean = jnp.mean(x, axis=-1, keepdims=True)
    var = jnp.mean((x - mean) ** 2, axis=-1, keepdims=True)
    return (x - mean) / jnp.sqrt(var + eps) * g + b


def _ref_gelu(x):
    return x * 0.5 * (1.0 + jax.lax.erf(x / math.sqrt(2.0)))


def _ref_attention(q, k, v):
    dh = q.shape[-1]
    s = jnp.einsum("gqd,gkd->gqk", q, k) / math.sqrt(dh)
    p = jax.nn.softmax(s, axis=-1)
    return jnp.einsum("gqk,gkd->gqd", p, v)


def _ref_mha(p, hidden_states, mode, head_num, frame_num):
    B, L, H = hidden_states.shape
    dh = H // head_num
    x2 = hidden_states.reshape(B * L, H)

    def proj(w, b):
        y = (x2 @ w + b).reshape(B, L, head_num, dh)
        return jnp.transpose(y, (0, 2, 1, 3)).reshape(B * head_num, L, dh)

    q, k, v = proj(p["wq"], p["bq"]), proj(p["wk"], p["bk"]), proj(p["wv"], p["bv"])

    def compute_attention(q_, k_, v_):
        q_len = q_.shape[1]
        attn = _ref_attention(q_, k_, v_)
        y = attn.reshape(-1, head_num, q_len, dh)
        y = jnp.transpose(y, (0, 2, 1, 3)).reshape(-1, q_len, H)
        n = y.shape[0]
        return ((y.reshape(n * q_len, H) @ p["wo"]) + p["bo"]).reshape(n, q_len, H)

    q_cls, k_cls, v_cls = q[:, 0], k[:, 0], v[:, 0]
    q_, k_, v_ = q[:, 1:], k[:, 1:], v[:, 1:]
    cls_output = compute_attention(q_cls[:, None, :], k, v)
    patch_num = q_.shape[1] // frame_num

    if mode == "time":
        def resh(i):
            i = i.reshape(B * head_num, frame_num, patch_num, dh)
            return jnp.transpose(i, (2, 0, 1, 3)).reshape(-1, frame_num, dh)
        q_, k_, v_ = resh(q_), resh(k_), resh(v_)
        kc = jnp.broadcast_to(k_cls[None], (patch_num, B * head_num, dh)).reshape(-1, 1, dh)
        vc = jnp.broadcast_to(v_cls[None], (patch_num, B * head_num, dh)).reshape(-1, 1, dh)
        out = compute_attention(q_, jnp.concatenate((kc, k_), axis=1),
                                jnp.concatenate((vc, v_), axis=1))
        out = out.reshape(patch_num, B, frame_num, H)
        out = jnp.transpose(out, (1, 2, 0, 3)).reshape(B, -1, H)
        return jnp.concatenate((cls_output, out), axis=1)

    if mode == "space":
        def resh(i):
            i = i.reshape(B * head_num, frame_num, patch_num, dh)
            return jnp.transpose(i, (1, 0, 2, 3)).reshape(-1, patch_num, dh)
        q_, k_, v_ = resh(q_), resh(k_), resh(v_)
        kc = jnp.broadcast_to(k_cls[None], (frame_num, B * head_num, dh)).reshape(-1, 1, dh)
        vc = jnp.broadcast_to(v_cls[None], (frame_num, B * head_num, dh)).reshape(-1, 1, dh)
        out = compute_attention(q_, jnp.concatenate((kc, k_), axis=1),
                                jnp.concatenate((vc, v_), axis=1))
        out = out.reshape(frame_num, B, patch_num, H)
        out = jnp.transpose(out, (1, 0, 2, 3)).reshape(B, -1, H)
        return jnp.concatenate((cls_output, out), axis=1)

    raise NotImplementedError(mode)


def timesformer_layer_ref(params, x, head_num, frame_num):
    residual = x
    h = _ref_layernorm(x, params["ln1_g"], params["ln1_b"])
    x = residual + _ref_mha(params["attn_time"], h, "time", head_num, frame_num)
    residual = x
    h = _ref_layernorm(x, params["ln2_g"], params["ln2_b"])
    x = residual + _ref_mha(params["attn_space"], h, "space", head_num, frame_num)
    residual = x
    h = _ref_layernorm(x, params["ln3_g"], params["ln3_b"])
    ff = _ref_gelu(h.reshape(-1, h.shape[-1]) @ params["ff"]["w1"] + params["ff"]["b1"])
    ff = (ff @ params["ff"]["w2"] + params["ff"]["b2"]).reshape(x.shape)
    return residual + ff


# --------------------------------------------------------------------------
# parameter init
# --------------------------------------------------------------------------

def init_params(key, hidden, intermediate):
    keys = jax.random.split(key, 32)
    ki = iter(keys)

    def lin(din, dout):
        w = jax.random.normal(next(ki), (din, dout), jnp.float32) * 0.02
        b = jax.random.normal(next(ki), (dout,), jnp.float32) * 0.02
        return w, b

    def mha():
        p = {}
        for name in ("q", "k", "v", "o"):
            w, b = lin(hidden, hidden)
            p["w" + name], p["b" + name] = w, b
        return p

    params = {
        "attn_time": mha(),
        "attn_space": mha(),
        "ln1_g": jnp.ones((hidden,), jnp.float32), "ln1_b": jnp.zeros((hidden,), jnp.float32),
        "ln2_g": jnp.ones((hidden,), jnp.float32), "ln2_b": jnp.zeros((hidden,), jnp.float32),
        "ln3_g": jnp.ones((hidden,), jnp.float32), "ln3_b": jnp.zeros((hidden,), jnp.float32),
    }
    w1, b1 = lin(hidden, intermediate)
    w2, b2 = lin(intermediate, hidden)
    params["ff"] = {"w1": w1, "b1": b1, "w2": w2, "b2": b2}
    return params


# --------------------------------------------------------------------------
# main
# --------------------------------------------------------------------------

if __name__ == "__main__":
    HIDDEN, INTER, HEADS = 32, 64, 4
    FRAMES, PATCHES, BATCH = 2, 4, 2          # video_cfg['sample_num'] = FRAMES
    SEQ = 1 + FRAMES * PATCHES                # CLS + frame_num * patch_num

    key = jax.random.PRNGKey(0)
    kp, kx = jax.random.split(key)
    params = init_params(kp, HIDDEN, INTER)
    x = jax.random.normal(kx, (BATCH, SEQ, HIDDEN), jnp.float32)

    cfg = make_config()                                   # bf16 matmuls, f32 accumulation
    pparams = prepare_pallas_params(params, cfg["compute_dtype"])

    out = timesformer_layer_pallas(pparams, x, HEADS, FRAMES, cfg)
    out = jax.block_until_ready(out)

    ref = timesformer_layer_ref(params, x, HEADS, FRAMES)
    ref = jax.block_until_ready(ref)

    assert out.shape == (BATCH, SEQ, HIDDEN), out.shape
    max_err = float(jnp.max(jnp.abs(out - ref)))
    if not bool(jnp.allclose(out, ref, atol=2e-2, rtol=2e-2)):
        raise AssertionError(
            f"Pallas output mismatch vs pure-JAX reference (max |err| = {max_err:.3e})")
    print("KERNEL_OK")
</pallas_src>

<mosaic_0001>
module attributes {stable_mosaic.version = 11 : i64} {
  func.func @_ln_matmul_kernel(%arg0: i32, %arg1: i32, %arg2: memref<18x32xf32, #tpu.memory_space<vmem>>, %arg3: memref<1x32xf32, #tpu.memory_space<vmem>>, %arg4: memref<1x32xf32, #tpu.memory_space<vmem>>, %arg5: memref<32x96xbf16, #tpu.memory_space<vmem>>, %arg6: memref<1x96xf32, #tpu.memory_space<vmem>>, %arg7: memref<18x96xf32, #tpu.memory_space<vmem>>) attributes {dimension_semantics = [#tpu.dimension_semantics<parallel>, #tpu.dimension_semantics<parallel>], iteration_bounds = array<i64: 1, 1>, scalar_prefetch = 0 : i64, scratch_operands = 0 : i64, tpu.core_type = #tpu.core_type<tc>, window_params = [{transform_indices = @transform_0, window_bounds = array<i64: 18, 32>}, {pipeline_mode = #tpu.pipeline_mode<synchronous>, transform_indices = @transform_1, window_bounds = array<i64: 1, 32>}, {pipeline_mode = #tpu.pipeline_mode<synchronous>, transform_indices = @transform_2, window_bounds = array<i64: 1, 32>}, {transform_indices = @transform_3, window_bounds = array<i64: 32, 96>}, {transform_indices = @transform_4, window_bounds = array<i64: 1, 96>}, {transform_indices = @transform_5, window_bounds = array<i64: 18, 96>}]} {
    %c0 = arith.constant 0 : index
    %c0_0 = arith.constant 0 : index
    %0 = vector.load %arg2[%c0, %c0_0] : memref<18x32xf32, #tpu.memory_space<vmem>>, vector<18x32xf32>
    %cst = arith.constant dense<0.000000e+00> : vector<18xf32>
    %1 = vector.multi_reduction <add>, %0, %cst [1] : vector<18x32xf32> to vector<18xf32>
    %2 = vector.shape_cast %1 : vector<18xf32> to vector<18x1xf32>
    %cst_1 = arith.constant 3.200000e+01 : f32
    %3 = vector.broadcast %cst_1 : f32 to vector<18x1xf32>
    %4 = arith.divf %2, %3 : vector<18x1xf32>
    %5 = vector.broadcast %4 : vector<18x1xf32> to vector<18x32xf32>
    %6 = arith.subf %0, %5 : vector<18x32xf32>
    %7 = arith.mulf %6, %6 : vector<18x32xf32>
    %cst_2 = arith.constant dense<0.000000e+00> : vector<18xf32>
    %8 = vector.multi_reduction <add>, %7, %cst_2 [1] : vector<18x32xf32> to vector<18xf32>
    %9 = vector.shape_cast %8 : vector<18xf32> to vector<18x1xf32>
    %cst_3 = arith.constant 3.200000e+01 : f32
    %10 = vector.broadcast %cst_3 : f32 to vector<18x1xf32>
    %11 = arith.divf %9, %10 : vector<18x1xf32>
    %cst_4 = arith.constant 9.99999996E-13 : f32
    %12 = vector.broadcast %cst_4 : f32 to vector<18x1xf32>
    %13 = arith.addf %11, %12 : vector<18x1xf32>
    %14 = math.rsqrt %13 : vector<18x1xf32>
    %15 = vector.broadcast %14 : vector<18x1xf32> to vector<18x32xf32>
    %16 = arith.mulf %6, %15 : vector<18x32xf32>
    %c0_5 = arith.constant 0 : index
    %c0_6 = arith.constant 0 : index
    %17 = vector.load %arg3[%c0_5, %c0_6] : memref<1x32xf32, #tpu.memory_space<vmem>>, vector<1x32xf32>
    %18 = vector.broadcast %17 : vector<1x32xf32> to vector<18x32xf32>
    %19 = arith.mulf %16, %18 : vector<18x32xf32>
    %c0_7 = arith.constant 0 : index
    %c0_8 = arith.constant 0 : index
    %20 = vector.load %arg4[%c0_7, %c0_8] : memref<1x32xf32, #tpu.memory_space<vmem>>, vector<1x32xf32>
    %21 = vector.broadcast %20 : vector<1x32xf32> to vector<18x32xf32>
    %22 = arith.addf %19, %21 : vector<18x32xf32>
    %23 = arith.truncf %22 : vector<18x32xf32> to vector<18x32xbf16>
    %c0_9 = arith.constant 0 : index
    %c0_10 = arith.constant 0 : index
    %24 = vector.load %arg5[%c0_9, %c0_10] : memref<32x96xbf16, #tpu.memory_space<vmem>>, vector<32x96xbf16>
    %cst_11 = arith.constant dense<0.000000e+00> : vector<18x96xf32>
    %25 = tpu.matmul %23, %24, %cst_11 {dimension_numbers = #tpu.dot_dimension_numbers<[1], [0], [0], [1], [0, 0, 1, 1], [], []>} : vector<18x32xbf16>, vector<32x96xbf16>, vector<18x96xf32> -> vector<18x96xf32>
    %c0_12 = arith.constant 0 : index
    %c0_13 = arith.constant 0 : index
    %26 = vector.load %arg6[%c0_12, %c0_13] : memref<1x96xf32, #tpu.memory_space<vmem>>, vector<1x96xf32>
    %27 = vector.broadcast %26 : vector<1x96xf32> to vector<18x96xf32>
    %28 = arith.addf %25, %27 : vector<18x96xf32>
    %c0_14 = arith.constant 0 : index
    %c0_15 = arith.constant 0 : index
    %29 = vector.load %arg7[%c0_14, %c0_15] : memref<18x96xf32, #tpu.memory_space<vmem>>, vector<18x96xf32>
    tpu.vector_store %arg7[%c0_14, %c0_15], %28 {strides = array<i32>} : memref<18x96xf32, #tpu.memory_space<vmem>>, vector<18x96xf32>,
    return
  }
  func.func @transform_0(%arg0: i32, %arg1: i32) -> (i32, i32) {
    %c0_i32 = arith.constant 0 : i32
    %c0_i32_0 = arith.constant 0 : i32
    return %arg0, %c0_i32 : i32, i32
  }
  func.func @transform_1(%arg0: i32, %arg1: i32) -> (i32, i32) {
    %c0_i32 = arith.constant 0 : i32
    %c0_i32_0 = arith.constant 0 : i32
    %c0_i32_1 = arith.constant 0 : i32
    return %c0_i32, %c0_i32_0 : i32, i32
  }
  func.func @transform_2(%arg0: i32, %arg1: i32) -> (i32, i32) {
    %c0_i32 = arith.constant 0 : i32
    %c0_i32_0 = arith.constant 0 : i32
    %c0_i32_1 = arith.constant 0 : i32
    return %c0_i32, %c0_i32_0 : i32, i32
  }
  func.func @transform_3(%arg0: i32, %arg1: i32) -> (i32, i32) {
    %c0_i32 = arith.constant 0 : i32
    %c0_i32_0 = arith.constant 0 : i32
    return %c0_i32, %arg1 : i32, i32
  }
  func.func @transform_4(%arg0: i32, %arg1: i32) -> (i32, i32) {
    %c0_i32 = arith.constant 0 : i32
    %c0_i32_0 = arith.constant 0 : i32
    return %c0_i32, %arg1 : i32, i32
  }
  func.func @transform_5(%arg0: i32, %arg1: i32) -> (i32, i32) {
    %c0_i32 = arith.constant 0 : i32
    return %arg0, %arg1 : i32, i32
  }
}

</mosaic_0001>

<bundles_post_ra>
// kernel: tpu_custom_call.1
= control target key start
LH: loop header
LB: loop body
LE: loop exit
PB: predicated region body
PF: predicated region fallthrough
CT: control target
= control target key end

     0   :  { %10 = vsyncpa [#allocation3], 0  ;;  %s419_s0 = inlined_call_operand.hbm [shape: f32[18,32], index: 0, kind: input, shape index: {}]   ;;  %s420_s1 = inlined_call_operand.vmem [shape: f32[1,32], index: 1, kind: input, shape index: {}]   ;;  %s421_s2 = inlined_call_operand.vmem [shape: f32[1,32], index: 2, kind: input, shape index: {}]   ;;  %s422_s3 = inlined_call_operand.hbm [shape: bf16[32,96], index: 3, kind: input, shape index: {}]   ;;  %s423_s4 = inlined_call_operand.vmem [shape: f32[1,96], index: 4, kind: input, shape index: {}]   ;;  %s424_s5 = inlined_call_operand.hbm [shape: f32[18,96], index: 5, kind: output, shape index: {}]  }
   0x1   :  { %11 = vsyncpa [#allocation6], 0 }
   0x2   :  { %12 = vsyncpa [#allocation4], 0  ;;  %s323_s18 = smov [#allocation2]   ;;  %s251_s22 = scalar_lea.hbm %s419_s0, 384 }
   0x3   :  { %s18_s19 = sshll.u32 %s323_s18, 4  ;;  %p252_p0 = scmp.ne.s32.totalorder %s419_s0, %s251_s22  ;;  %s19_s19 = int_to_ptr.vmem [resolvable:$true] %s18_s19 }
   0x4   :  { %p255_p1 = scmp.lt.u32.totalorder %s251_s22, %s419_s0 }
   0x6   :  { %p257_p2 = pnand %p255_p1, %p252_p0 }
   0x8   :  { %260 = shalt.err (!%p257_p2)
}
   0x9   :  { %s261_s27 = scalar_lea.vmem %s19_s19, 384  ;;  %p266_p4 = scmp.lt.s32.totalorder %s19_s19, %s19_s19 }
   0xa   :  { %p262_p3 = scmp.ne.s32.totalorder %s19_s19, %s261_s27  ;;  %p267_p5 = scmp.lt.s32.totalorder %s261_s27, %s261_s27 }
   0xc   :  { %p268_p6 = por %p267_p5, %p266_p4 }
   0xe   :  { %p269_p7 = pnand %p268_p6, %p262_p3 }
  0x10   :  { %272 = shalt.err (!%p269_p7)
}
  0x11   :  { %s324_s28 = smov 128   ;;  %s325_s29 = smov 8  }
  0x12   :  { %24 = dma.hbm_to_vmem [thread:$0]  %s419_s0, 384, %s19_s19, [#allocation3], %s324_s28, %s324_s28, %s325_s29  }
  0x13   :  { %s326_s7 = smov [#allocation5]   ;;  %s273_s11 = scalar_lea.hbm %s422_s3, 256 }
  0x14   :  { %s34_s8 = sshll.u32 %s326_s7, 4  ;;  %p274_p8 = scmp.ne.s32.totalorder %s422_s3, %s273_s11  ;;  %s35_s8 = int_to_ptr.vmem [resolvable:$true] %s34_s8 }
  0x15   :  { %p277_p9 = scmp.lt.u32.totalorder %s273_s11, %s422_s3 }
  0x17   :  { %p279_p10 = pnand %p277_p9, %p274_p8 }
  0x19   :  { %282 = shalt.err (!%p279_p10)
}
  0x1a   :  { %s283_s16 = scalar_lea.vmem %s35_s8, 256  ;;  %p288_p12 = scmp.lt.s32.totalorder %s35_s8, %s35_s8 }
  0x1b   :  { %p284_p11 = scmp.ne.s32.totalorder %s35_s8, %s283_s16  ;;  %p289_p13 = scmp.lt.s32.totalorder %s283_s16, %s283_s16 }
  0x1d   :  { %p290_p0 = por %p289_p13, %p288_p12 }
  0x1f   :  { %p291_p1 = pnand %p290_p0, %p284_p11 }
  0x21   :  { %294 = shalt.err (!%p291_p1)
}
  0x22   :  { %s327_s0 = smov 64   ;;  %s328_s17 = smov 4  }
  0x23   :  { %40 = dma.hbm_to_vmem [thread:$0]  %s422_s3, 256, %s35_s8, [#allocation6], %s327_s0, %s327_s0, %s328_s17  }
  0x24   :  { %317 = dma.done.wait [#allocation3], 384  }
  0x25   :  { %318 = vsyncadd [#allocation3], 4294966912 }
  0x26   :  { %319 = dma.done.wait [#allocation6], 256  }
  0x27   :  { %320 = vsyncadd [#allocation6], 4294967040  ;;  %vm53_vm0 = vcmask 261120   ;;  %vm60_vm1 = vcmask 254976   ;;  %v50_v0 = vld [vmem:[#allocation2] sm:$0xff]  ;;  %v51_v2 = vld [vmem:[#allocation2 + $0x8] sm:$0xff] }
  0x28   :  { %v52_v1 = vld [vmem:[#allocation2 + $0x10] sm:$0x3]  ;;  %v54_v3 = vsel %vm53_vm0, %v50_v0, 0.0  ;;  %v57_v5 = vsel %vm53_vm0, %v51_v2, 0.0  ;;  %v243_v21 = vld [vmem:[#allocation5] sm:$0xff]   ;;  %v244_v22 = vld [vmem:[#allocation5 + $0x8] sm:$0xff]  }
  0x29   :  { %v61_v4 = vsel %vm60_vm1, %v52_v1, 0.0  ;;  %55 = vadd.xlane.f32.xlu0 %v54_v3  ;;  %228 = vmatprep.subr.bf16.mxu0 %v243_v21  ;;  %v217_v34 = vld [vmem:[%s420_s1] ss:$0 sm:$0xff]  ;;  %vm197_vm2 = vcmask 779264   ;;  %vm194_vm3 = vcmask 785408  }
  0x2a   :  { %62 = vadd.xlane.f32.xlu1 %v61_v4  ;;  %229 = vmatpush3.bf16.msra.mxu0 %v243_v21  ;;  %v218_v40 = vld [vmem:[%s421_s2] ss:$0 sm:$0xff]  ;;  %s329_s2 = smov [#allocation7]  }
  0x2b   :  { %230 = vmatprep.subr.bf16.mxu0 %v244_v22  ;;  %v219_v48 = vld [vmem:[%s423_s4] ss:$0 sm:$0xff]  ;;  %s204_s24 = sshll.u32 %s329_s2, 4  ;;  %s205_s24 = int_to_ptr.vmem [resolvable:$true] %s204_s24 }
  0x2c   :  { %s295_s25 = scalar_lea.vmem %s205_s24, 384  ;;  %p300_p3 = scmp.lt.s32.totalorder %s205_s24, %s205_s24 }
  0x2d   :  { %58 = vadd.xlane.f32.xlu0 %v57_v5  ;;  %p296_p2 = scmp.ne.s32.totalorder %s205_s24, %s295_s25  ;;  %p301_p4 = scmp.lt.s32.totalorder %s295_s25, %s295_s25 }
  0x2e   :  { %231 = vmatpush3.bf16.msra.mxu0 %v244_v22 }
  0x2f   :  { %p302_p5 = por %p301_p4, %p300_p3 }
  0x31   :  { %p303_p6 = pnand %p302_p5, %p296_p2 }
  0xb6   :  { %v56_v6 = vpop.xlane.xlu0 %55 }
  0xb7   :  { %v63_v7 = vpop.xlane.xlu1 %62  ;;  %v65_v8 = vmul.f32 0.03125, %v56_v6 }
  0xb8   :  { %v67_v9 = vmul.f32 0.03125, %v63_v7 }
  0xb9   :  { %v68_v10 = vsub.f32 %v50_v0, %v65_v8 }
  0xba   :  { %v70_v11 = vsub.f32 %v52_v1, %v67_v9  ;;  %v59_v12 = vpop.xlane.xlu0 %58 }
  0xbb   :  { %v66_v13 = vmul.f32 0.03125, %v59_v12  ;;  %v71_v14 = vmul.f32 %v68_v10, %v68_v10 }
  0xbc   :  { %v73_v15 = vmul.f32 %v70_v11, %v70_v11 }
  0xbd   :  { %v69_v16 = vsub.f32 %v51_v2, %v66_v13  ;;  %v74_v17 = vsel %vm53_vm0, %v71_v14, 0.0 }
  0xbe   :  { %75 = vadd.xlane.f32.xlu1 %v74_v17  ;;  %v80_v18 = vsel %vm60_vm1, %v73_v15, 0.0 }
  0xbf   :  { %v72_v19 = vmul.f32 %v69_v16, %v69_v16 }
  0xc1   :  { %v77_v20 = vsel %vm53_vm0, %v72_v19, 0.0 }
  0xc2   :  { %81 = vadd.xlane.f32.xlu1 %v80_v18  ;;  %78 = vadd.xlane.f32.xlu0 %v77_v20 }
 0x14b   :  { %v76_v23 = vpop.xlane.xlu1 %75 }
 0x14c   :  { %v83_v24 = vmul.f32 0.03125, %v76_v23 }
 0x14e   :  { %v86_v25 = vadd.f32 1e-12, %v83_v24 }
 0x14f   :  { %v82_v26 = vpop.xlane.xlu1 %81  ;;  %v79_v27 = vpop.xlane.xlu0 %78 }
 0x150   :  { %245 = vrsqrt.f32 %v86_v25  ;;  %v85_v28 = vmul.f32 0.03125, %v82_v26  ;;  %v84_v29 = vmul.f32 0.03125, %v79_v27 }
 0x152   :  { %v88_v30 = vadd.f32 1e-12, %v85_v28  ;;  %v87_v31 = vadd.f32 1e-12, %v84_v29 }
 0x154   :  { %247 = vrsqrt.f32 %v88_v30 }
 0x155   :  { %249 = vrsqrt.f32 %v87_v31 }
 0x15a   :  { %v246_v32 = vpop.eup %245 }
 0x15b   :  { %v92_v33 = vmul.f32 %v246_v32, %v68_v10 }
 0x15d   :  { %v102_v39 = vmul.f32 %v217_v34, %v92_v33 }
 0x15e   :  { %v248_v35 = vpop.eup %247 }
 0x15f   :  { %v250_v36 = vpop.eup %249  ;;  %v94_v37 = vmul.f32 %v248_v35, %v70_v11  ;;  %v112_v44 = vadd.f32 %v218_v40, %v102_v39 }
 0x160   :  { %v93_v38 = vmul.f32 %v250_v36, %v69_v16 }
 0x161   :  { %v104_v41 = vmul.f32 %v217_v34, %v94_v37 }
 0x162   :  { %v103_v42 = vmul.f32 %v217_v34, %v93_v38 }
 0x163   :  { %v114_v43 = vadd.f32 %v218_v40, %v104_v41 }
 0x164   :  { %v113_v45 = vadd.f32 %v218_v40, %v103_v42 }
 0x165   :  { %v116_v46 = vpack.c.bf16 %v114_v43, %v114_v43 }
 0x166   :  { %v115_v47 = vpack.c.bf16 %v113_v45, %v112_v44 }
 0x168   :  { %232 = vmatprep.mubr.msk.bf16.mxu0 %vm53_vm0, %v115_v47 }
 0x169   :  { %233 = vmatmul.mubr.msk.bf16.vlgmr.msra.gmra.mrb[0].mxu0 %vm53_vm0, %v116_v46 }
 0x23c   :  { %v234_v49 = vpop.f32.mrb[0].mxu0 }
 0x23d   :  { %v189_v50 = vadd.f32 %v234_v49, %v219_v48  ;;  %v180_v51 = vpop.f32.mrb[1].mxu0 }
 0x23e   :  { %v181_v52 = vadd.f32 %v219_v48, %v180_v51  ;;  %v235_v53 = vpop.f32.mrb[2].mxu0 }
 0x23f   :  { %198 = vst.msk [vmem:[#allocation7 + $0x10] sm:$0x3] %vm197_vm2, %v189_v50  ;;  %v183_v54 = vpop.f32.mrb[3].mxu0 }
 0x240   :  { %195 = vst.msk [vmem:[#allocation7] sm:$0xff] %vm194_vm3, %v181_v52  ;;  %v184_v55 = vadd.f32 %v219_v48, %v183_v54 }
 0x242   :  { %196 = vst.msk [vmem:[#allocation7 + $0x8] sm:$0xff] %vm194_vm3, %v184_v55 }
 0x243   :  { %306 = shalt.err (!%p303_p6)
}
 0x244   :  { %s307_s27 = scalar_lea.hbm %s424_s5, 384 }
 0x245   :  { %p308_p7 = scmp.ne.s32.totalorder %s424_s5, %s307_s27  ;;  %p311_p8 = scmp.lt.u32.totalorder %s307_s27, %s424_s5 }
 0x247   :  { %p313_p9 = pnand %p311_p8, %p308_p7 }
 0x249   :  { %316 = shalt.err (!%p313_p9)
}
 0x24a   :  { %210 = dma.vmem_to_hbm [thread:$0]  %s205_s24, 384, %s424_s5, [#allocation4], %s324_s28, %s324_s28, %s325_s29  }
 0x24b   :  { %321 = dma.done.wait [#allocation4], 384  }
 0x24c   :  { %322 = vsyncadd [#allocation4], 4294966912 }
 0x24d   :  { %214 = vsyncpa [#allocation3], 1 }
 0x24e   :  { %215 = vsyncpa [#allocation6], 1 }
 0x24f   :  { %216 = vsyncpa [#allocation4], 1 }

</bundles_post_ra>
